<compile_context>
chip_gen: v6e
topology: v6e:2x2x1
jax: 0.10.0
libtpu: 0.0.40
codegen_flags: <defaults>
</compile_context>

<pallas_src>
import jax
import jax.numpy as jnp
import numpy as np
from jax import lax
from jax.experimental import pallas as pl
from jax.experimental.pallas import tpu as pltpu

NEG_INF = float("-inf")


def linear_ar_decoder_kernel(enc_ref, w_ref, table_ref, pos_ref, pad_ref,
                             bias_ref, sel_ref, out_ref):
    # enc_ref  : (B, TV, D)  float  encoder features (V tile on sublanes, D on lanes)
    # w_ref    : (1, D)      f32    nn.Linear(D, 1).weight
    # table_ref: (P, D)      f32    learned positional-embedding table
    # pos_ref  : (B, TV)     i32    positions into the table for this V tile
    # pad_ref  : (B, TV)     i32    1 where padded
    # bias_ref : (1,)        f32    [SMEM]  nn.Linear(D, 1).bias
    # sel_ref  : (B, S)      i32    [SMEM]  prev_sel_indxs
    # out_ref  : (B, S, TV)  f32
    B, TV, D = enc_ref.shape
    P = table_ref.shape[0]
    S = sel_ref.shape[1]

    w = w_ref[0]                                   # (D,)  on lanes
    bias = bias_ref[0]                             # scalar from SMEM

    # D -> 1 projection with no transpose: VPU multiply + cross-lane reduce.
    enc = enc_ref[...].astype(jnp.float32)                          # (B, TV, D)
    enc_score = jnp.sum(enc * w[None, None, :], axis=-1)            # (B, TV)

    # Positional contribution.  Linear(D,1)(enc + pos_emb) ==
    # Linear(D,1)(enc) + (table @ w)[positions], so only the tiny projected
    # table tw:(P,) is needed; the full (B, V, D) pos_emb never exists.
    tw = jnp.sum(table_ref[...] * w[None, :], axis=-1)              # (P,)
    pos = pos_ref[...]                                              # (B, TV) i32
    p_iota = lax.broadcasted_iota(jnp.int32, (B, TV, P), 2)
    pos_onehot = pos[:, :, None] == p_iota                          # (B, TV, P)
    pos_score = jnp.sum(
        jnp.where(pos_onehot, tw[None, None, :], 0.0), axis=-1)     # (B, TV)

    scores = enc_score + pos_score + bias                           # (B, TV)
    scores = jnp.where(pad_ref[...] > 0, NEG_INF, scores)           # padding -> -inf

    # Blocker mask: at step t, block every index selected at steps <= t.
    # Built from SMEM scalars with VPU compares (no MXU).  The iota is offset
    # by this tile's global V start so tiling over V stays correct.
    v0 = pl.program_id(0) * TV
    v_ids = lax.broadcasted_iota(jnp.int32, (S, TV), 1) + v0        # global V ids
    s_ids = lax.broadcasted_iota(jnp.int32, (S, TV), 0)             # step ids

    for b in range(B):                     # B is small & static -> unrolled
        def body(t, blocked):
            sel_bt = sel_ref[b, t]                                  # SMEM scalar
            hit = jnp.logical_and(v_ids == sel_bt, s_ids >= t)
            return blocked | hit.astype(jnp.int32)

        blocked = lax.fori_loop(0, S, body, jnp.zeros((S, TV), jnp.int32))
        row = jnp.broadcast_to(scores[b][None, :], (S, TV))
        out_ref[b] = jnp.where(blocked > 0, NEG_INF, row)


def _choose_v_tile(V, B, D, budget_bytes=24 * 1024 * 1024):
    """Largest multiple-of-128 tile that divides V and fits a VMEM budget;
    falls back to the full V extent (legal block = full dim) for small /
    irregular V so the grid collapses to a single step."""
    candidates = [tv for tv in (2048, 1024, 512, 256, 128) if V % tv == 0]
    if not candidates:
        return V
    fitting = [tv for tv in candidates if 3 * B * tv * D * 4 <= budget_bytes]
    return fitting[0] if fitting else candidates[-1]


def make_positions(padding_mask, padding_idx=1):
    """fairseq make_positions on tokens = padding_mask.long() with padding_idx=1.
    Cheap int glue kept in the wrapper."""
    # TODO(synk): cumsum-over-sequence position computation stays as wrapper glue.
    non_pad = jnp.logical_not(padding_mask)
    return (jnp.cumsum(non_pad.astype(jnp.int32), axis=1) * non_pad
            + padding_idx).astype(jnp.int32)


def linear_ar_decoder(enc_out, pos_table, weight, bias, padding_mask,
                      prev_sel_indxs, padding_idx=1):
    """enc_out: (B, V, D) float; pos_table: (P, D); weight: (1, D); bias: (1,);
    padding_mask: (B, V) bool; prev_sel_indxs: (B, S) int. Returns (B, S, V) f32."""
    B, V, D = enc_out.shape
    S = prev_sel_indxs.shape[1]
    P = pos_table.shape[0]

    positions = make_positions(padding_mask, padding_idx)            # (B, V) i32
    pad = padding_mask.astype(jnp.int32)                             # (B, V)
    sel = prev_sel_indxs.astype(jnp.int32)                           # (B, S)
    w = weight.astype(jnp.float32).reshape(1, D)
    b = bias.astype(jnp.float32).reshape(1)
    table = pos_table.astype(jnp.float32)

    TV = _choose_v_tile(V, B, D)
    grid = (V // TV,)

    return pl.pallas_call(
        linear_ar_decoder_kernel,
        out_shape=jax.ShapeDtypeStruct((B, S, V), jnp.float32),
        grid_spec=pltpu.PrefetchScalarGridSpec(
            num_scalar_prefetch=0,
            grid=grid,
            in_specs=[
                pl.BlockSpec((B, TV, D), lambda j: (0, j, 0)),       # encoder
                pl.BlockSpec((1, D), lambda j: (0, 0)),              # weight
                pl.BlockSpec((P, D), lambda j: (0, 0)),              # pos table
                pl.BlockSpec((B, TV), lambda j: (0, j)),             # positions
                pl.BlockSpec((B, TV), lambda j: (0, j)),             # padding mask
                pl.BlockSpec(memory_space=pltpu.MemorySpace.SMEM),   # bias
                pl.BlockSpec(memory_space=pltpu.MemorySpace.SMEM),   # prev_sel
            ],
            out_specs=pl.BlockSpec((B, S, TV), lambda j: (0, 0, j)),
        ),
        compiler_params=pltpu.CompilerParams(
            dimension_semantics=("parallel",),
            vmem_limit_bytes=32 * 1024 * 1024,
        ),
    )(enc_out, w, table, positions, pad, b, sel)


if __name__ == "__main__":
    B, V, D, S = 2, 16, 32, 8
    max_positions, padding_idx = 32, 1
    P = max_positions + padding_idx + 1

    key = jax.random.PRNGKey(0)
    k1, k2, k3, k4, k5 = jax.random.split(key, 5)

    enc_out = jax.random.normal(k1, (B, V, D), dtype=jnp.float32)
    weight = 0.1 * jax.random.normal(k2, (1, D), dtype=jnp.float32)   # Linear(D,1).weight
    bias = 0.1 * jax.random.normal(k3, (1,), dtype=jnp.float32)       # Linear(D,1).bias
    pos_table = 0.1 * jax.random.normal(k4, (P, D), dtype=jnp.float32)
    pos_table = pos_table.at[padding_idx].set(0.0)                    # padding row = 0

    lengths = jnp.array([13, 11], dtype=jnp.int32)
    padding_mask = jnp.arange(V)[None, :] >= lengths[:, None]         # (B, V) bool
    prev_sel_indxs = jax.random.randint(k5, (B, S), 0, V, dtype=jnp.int32)

    out = linear_ar_decoder(enc_out, pos_table, weight, bias,
                            padding_mask, prev_sel_indxs, padding_idx)
    out = jax.block_until_ready(out)

    # Pure-JAX reference following the PyTorch module.
    positions = make_positions(padding_mask, padding_idx)
    pos_emb = pos_table[positions]                                    # (B, V, D)
    x = enc_out + pos_emb
    scores_ref = jnp.einsum("bvd,d->bv", x, weight[0]) + bias[0]
    scores_ref = jnp.where(padding_mask, NEG_INF, scores_ref)
    onehot = prev_sel_indxs[:, :, None] == jnp.arange(V)[None, None, :]
    blocked = jnp.cumsum(onehot.astype(jnp.int32), axis=1) > 0
    ref = jnp.where(blocked, NEG_INF, scores_ref[:, None, :])

    assert out.shape == (B, S, V) and out.dtype == jnp.float32
    assert np.allclose(np.asarray(out), np.asarray(ref), atol=1e-4), \
        "kernel/reference mismatch"
    print("KERNEL_OK")
</pallas_src>

<mosaic_0001>
module attributes {stable_mosaic.version = 11 : i64} {
  func.func @linear_ar_decoder_kernel(%arg0: i32, %arg1: memref<2x16x32xf32, #tpu.memory_space<vmem>>, %arg2: memref<1x32xf32, #tpu.memory_space<vmem>>, %arg3: memref<34x32xf32, #tpu.memory_space<vmem>>, %arg4: memref<2x16xi32, #tpu.memory_space<vmem>>, %arg5: memref<2x16xi32, #tpu.memory_space<vmem>>, %arg6: memref<1xf32, #tpu.memory_space<smem>>, %arg7: memref<2x8xi32, #tpu.memory_space<smem>>, %arg8: memref<2x8x16xf32, #tpu.memory_space<vmem>>) attributes {dimension_semantics = [#tpu.dimension_semantics<parallel>], iteration_bounds = array<i64: 1>, scalar_prefetch = 0 : i64, scratch_operands = 0 : i64, tpu.core_type = #tpu.core_type<tc>, window_params = [{transform_indices = @transform_0, window_bounds = array<i64: 2, 16, 32>}, {pipeline_mode = #tpu.pipeline_mode<synchronous>, transform_indices = @transform_1, window_bounds = array<i64: 1, 32>}, {pipeline_mode = #tpu.pipeline_mode<synchronous>, transform_indices = @transform_2, window_bounds = array<i64: 34, 32>}, {transform_indices = @transform_3, window_bounds = array<i64: 2, 16>}, {transform_indices = @transform_4, window_bounds = array<i64: 2, 16>}, {transform_indices = @transform_5, window_bounds = array<i64: 1>}, {transform_indices = @transform_6, window_bounds = array<i64: 2, 8>}, {transform_indices = @transform_7, window_bounds = array<i64: 2, 8, 16>}]} {
    %c0 = arith.constant 0 : index
    %c0_0 = arith.constant 0 : index
    %0 = vector.load %arg2[%c0, %c0_0] : memref<1x32xf32, #tpu.memory_space<vmem>>, vector<1x32xf32>
    %1 = vector.shape_cast %0 : vector<1x32xf32> to vector<32xf32>
    %c0_1 = arith.constant 0 : index
    %2 = memref.load %arg6[%c0_1] : memref<1xf32, #tpu.memory_space<smem>>
    %c0_2 = arith.constant 0 : index
    %c0_3 = arith.constant 0 : index
    %c0_4 = arith.constant 0 : index
    %3 = vector.load %arg1[%c0_2, %c0_3, %c0_4] : memref<2x16x32xf32, #tpu.memory_space<vmem>>, vector<2x16x32xf32>
    %4 = vector.shape_cast %1 : vector<32xf32> to vector<1x1x32xf32>
    %5 = vector.broadcast %4 : vector<1x1x32xf32> to vector<2x16x32xf32>
    %6 = arith.mulf %3, %5 : vector<2x16x32xf32>
    %cst = arith.constant dense<0.000000e+00> : vector<2x16xf32>
    %7 = vector.multi_reduction <add>, %6, %cst [2] : vector<2x16x32xf32> to vector<2x16xf32>
    %c0_5 = arith.constant 0 : index
    %c0_6 = arith.constant 0 : index
    %8 = vector.load %arg3[%c0_5, %c0_6] : memref<34x32xf32, #tpu.memory_space<vmem>>, vector<34x32xf32>
    %9 = vector.shape_cast %1 : vector<32xf32> to vector<1x32xf32>
    %10 = vector.broadcast %9 : vector<1x32xf32> to vector<34x32xf32>
    %11 = arith.mulf %8, %10 : vector<34x32xf32>
    %cst_7 = arith.constant dense<0.000000e+00> : vector<34xf32>
    %12 = vector.multi_reduction <add>, %11, %cst_7 [1] : vector<34x32xf32> to vector<34xf32>
    %c0_8 = arith.constant 0 : index
    %c0_9 = arith.constant 0 : index
    %13 = vector.load %arg4[%c0_8, %c0_9] : memref<2x16xi32, #tpu.memory_space<vmem>>, vector<2x16xi32>
    %14 = tpu.iota {dimensions = array<i32: 2>} : vector<2x16x34xi32>
    %15 = vector.shape_cast %13 : vector<2x16xi32> to vector<2x16x1xi32>
    %16 = vector.broadcast %15 : vector<2x16x1xi32> to vector<2x16x34xi32>
    %17 = arith.cmpi eq, %16, %14 : vector<2x16x34xi32>
    %18 = vector.shape_cast %12 : vector<34xf32> to vector<1x1x34xf32>
    %cst_10 = arith.constant 0.000000e+00 : f32
    %19 = vector.shape_cast %18 : vector<1x1x34xf32> to vector<1x1x34xf32>
    %20 = vector.broadcast %19 : vector<1x1x34xf32> to vector<2x16x34xf32>
    %21 = vector.broadcast %cst_10 : f32 to vector<2x16x34xf32>
    %22 = arith.select %17, %20, %21 : vector<2x16x34xi1>, vector<2x16x34xf32>
    %cst_11 = arith.constant dense<0.000000e+00> : vector<2x16xf32>
    %23 = vector.multi_reduction <add>, %22, %cst_11 [2] : vector<2x16x34xf32> to vector<2x16xf32>
    %24 = arith.addf %7, %23 : vector<2x16xf32>
    %25 = vector.broadcast %2 : f32 to vector<2x16xf32>
    %26 = arith.addf %24, %25 : vector<2x16xf32>
    %c0_12 = arith.constant 0 : index
    %c0_13 = arith.constant 0 : index
    %27 = vector.load %arg5[%c0_12, %c0_13] : memref<2x16xi32, #tpu.memory_space<vmem>>, vector<2x16xi32>
    %c0_i32 = arith.constant 0 : i32
    %28 = vector.broadcast %c0_i32 : i32 to vector<2x16xi32>
    %29 = arith.cmpi sgt, %27, %28 : vector<2x16xi32>
    %cst_14 = arith.constant 0xFF800000 : f32
    %30 = vector.broadcast %cst_14 : f32 to vector<2x16xf32>
    %31 = arith.select %29, %30, %26 : vector<2x16xi1>, vector<2x16xf32>
    %c16_i32 = arith.constant 16 : i32
    %32 = arith.muli %arg0, %c16_i32 : i32
    %33 = tpu.iota {dimensions = array<i32: 1>} : vector<8x16xi32>
    %34 = vector.broadcast %32 : i32 to vector<8x16xi32>
    %35 = arith.addi %33, %34 : vector<8x16xi32>
    %36 = tpu.iota {dimensions = array<i32: 0>} : vector<8x16xi32>
    %c0_i32_15 = arith.constant 0 : i32
    %37 = vector.broadcast %c0_i32_15 : i32 to vector<8x16xi32>
    %c0_i32_16 = arith.constant 0 : i32
    %c8_i32 = arith.constant 8 : i32
    %38 = arith.addi %c0_i32_16, %c8_i32 : i32
    %c1_i32 = arith.constant 1 : i32
    %39 = scf.for %arg9 = %c0_i32_16 to %38 step %c1_i32 iter_args(%arg10 = %37) -> (vector<8x16xi32>)  : i32 {
      %c0_32 = arith.constant 0 : index
      %67 = arith.index_cast %arg9 : i32 to index
      %68 = memref.load %arg7[%c0_32, %67] : memref<2x8xi32, #tpu.memory_space<smem>>
      %69 = vector.broadcast %68 : i32 to vector<8x16xi32>
      %70 = arith.cmpi eq, %35, %69 : vector<8x16xi32>
      %71 = vector.broadcast %arg9 : i32 to vector<8x16xi32>
      %72 = arith.cmpi sge, %36, %71 : vector<8x16xi32>
      %73 = arith.andi %70, %72 : vector<8x16xi1>
      %74 = arith.extui %73 : vector<8x16xi1> to vector<8x16xi32>
      %75 = arith.ori %arg10, %74 : vector<8x16xi32>
      scf.yield %75 : vector<8x16xi32>
    }
    %c8_i32_17 = arith.constant 8 : i32
    %40 = vector.extract_strided_slice %31 {offsets = [0, 0], sizes = [1, 16], strides = [1, 1]} : vector<2x16xf32> to vector<1x16xf32>
    %41 = vector.shape_cast %40 : vector<1x16xf32> to vector<16xf32>
    %42 = vector.shape_cast %41 : vector<16xf32> to vector<1x16xf32>
    %43 = vector.shape_cast %42 : vector<1x16xf32> to vector<1x16xf32>
    %44 = vector.broadcast %43 : vector<1x16xf32> to vector<8x16xf32>
    %c0_i32_18 = arith.constant 0 : i32
    %45 = vector.broadcast %c0_i32_18 : i32 to vector<8x16xi32>
    %46 = arith.cmpi sgt, %39, %45 : vector<8x16xi32>
    %cst_19 = arith.constant 0xFF800000 : f32
    %47 = vector.broadcast %cst_19 : f32 to vector<8x16xf32>
    %48 = arith.select %46, %47, %44 : vector<8x16xi1>, vector<8x16xf32>
    %c0_20 = arith.constant 0 : index
    %c0_21 = arith.constant 0 : index
    %c0_22 = arith.constant 0 : index
    %49 = vector.load %arg8[%c0_20, %c0_21, %c0_22] : memref<2x8x16xf32, #tpu.memory_space<vmem>>, vector<1x8x16xf32>
    %50 = vector.shape_cast %49 : vector<1x8x16xf32> to vector<8x16xf32>
    %51 = vector.shape_cast %48 : vector<8x16xf32> to vector<1x8x16xf32>
    tpu.vector_store %arg8[%c0_20, %c0_21, %c0_22], %51 {strides = array<i32>} : memref<2x8x16xf32, #tpu.memory_space<vmem>>, vector<1x8x16xf32>,
    %c0_i32_23 = arith.constant 0 : i32
    %52 = vector.broadcast %c0_i32_23 : i32 to vector<8x16xi32>
    %c0_i32_24 = arith.constant 0 : i32
    %c8_i32_25 = arith.constant 8 : i32
    %53 = arith.addi %c0_i32_24, %c8_i32_25 : i32
    %c1_i32_26 = arith.constant 1 : i32
    %54 = scf.for %arg9 = %c0_i32_24 to %53 step %c1_i32_26 iter_args(%arg10 = %52) -> (vector<8x16xi32>)  : i32 {
      %c1_32 = arith.constant 1 : index
      %67 = arith.index_cast %arg9 : i32 to index
      %68 = memref.load %arg7[%c1_32, %67] : memref<2x8xi32, #tpu.memory_space<smem>>
      %69 = vector.broadcast %68 : i32 to vector<8x16xi32>
      %70 = arith.cmpi eq, %35, %69 : vector<8x16xi32>
      %71 = vector.broadcast %arg9 : i32 to vector<8x16xi32>
      %72 = arith.cmpi sge, %36, %71 : vector<8x16xi32>
      %73 = arith.andi %70, %72 : vector<8x16xi1>
      %74 = arith.extui %73 : vector<8x16xi1> to vector<8x16xi32>
      %75 = arith.ori %arg10, %74 : vector<8x16xi32>
      scf.yield %75 : vector<8x16xi32>
    }
    %c8_i32_27 = arith.constant 8 : i32
    %55 = vector.extract_strided_slice %31 {offsets = [1, 0], sizes = [1, 16], strides = [1, 1]} : vector<2x16xf32> to vector<1x16xf32>
    %56 = vector.shape_cast %55 : vector<1x16xf32> to vector<16xf32>
    %57 = vector.shape_cast %56 : vector<16xf32> to vector<1x16xf32>
    %58 = vector.shape_cast %57 : vector<1x16xf32> to vector<1x16xf32>
    %59 = vector.broadcast %58 : vector<1x16xf32> to vector<8x16xf32>
    %c0_i32_28 = arith.constant 0 : i32
    %60 = vector.broadcast %c0_i32_28 : i32 to vector<8x16xi32>
    %61 = arith.cmpi sgt, %54, %60 : vector<8x16xi32>
    %cst_29 = arith.constant 0xFF800000 : f32
    %62 = vector.broadcast %cst_29 : f32 to vector<8x16xf32>
    %63 = arith.select %61, %62, %59 : vector<8x16xi1>, vector<8x16xf32>
    %c1 = arith.constant 1 : index
    %c0_30 = arith.constant 0 : index
    %c0_31 = arith.constant 0 : index
    %64 = vector.load %arg8[%c1, %c0_30, %c0_31] : memref<2x8x16xf32, #tpu.memory_space<vmem>>, vector<1x8x16xf32>
    %65 = vector.shape_cast %64 : vector<1x8x16xf32> to vector<8x16xf32>
    %66 = vector.shape_cast %63 : vector<8x16xf32> to vector<1x8x16xf32>
    tpu.vector_store %arg8[%c1, %c0_30, %c0_31], %66 {strides = array<i32>} : memref<2x8x16xf32, #tpu.memory_space<vmem>>, vector<1x8x16xf32>,
    return
  }
  func.func @transform_0(%arg0: i32) -> (i32, i32, i32) {
    %c0_i32 = arith.constant 0 : i32
    %c0_i32_0 = arith.constant 0 : i32
    %c0_i32_1 = arith.constant 0 : i32
    return %c0_i32, %arg0, %c0_i32_0 : i32, i32, i32
  }
  func.func @transform_1(%arg0: i32) -> (i32, i32) {
    %c0_i32 = arith.constant 0 : i32
    %c0_i32_0 = arith.constant 0 : i32
    %c0_i32_1 = arith.constant 0 : i32
    return %c0_i32, %c0_i32_0 : i32, i32
  }
  func.func @transform_2(%arg0: i32) -> (i32, i32) {
    %c0_i32 = arith.constant 0 : i32
    %c0_i32_0 = arith.constant 0 : i32
    %c0_i32_1 = arith.constant 0 : i32
    return %c0_i32, %c0_i32_0 : i32, i32
  }
  func.func @transform_3(%arg0: i32) -> (i32, i32) {
    %c0_i32 = arith.constant 0 : i32
    %c0_i32_0 = arith.constant 0 : i32
    return %c0_i32, %arg0 : i32, i32
  }
  func.func @transform_4(%arg0: i32) -> (i32, i32) {
    %c0_i32 = arith.constant 0 : i32
    %c0_i32_0 = arith.constant 0 : i32
    return %c0_i32, %arg0 : i32, i32
  }
  func.func @transform_5(%arg0: i32) -> i32 {
    %c0_i32 = arith.constant 0 : i32
    %c0_i32_0 = arith.constant 0 : i32
    return %c0_i32 : i32
  }
  func.func @transform_6(%arg0: i32) -> (i32, i32) {
    %c0_i32 = arith.constant 0 : i32
    %c0_i32_0 = arith.constant 0 : i32
    %c0_i32_1 = arith.constant 0 : i32
    return %c0_i32, %c0_i32_0 : i32, i32
  }
  func.func @transform_7(%arg0: i32) -> (i32, i32, i32) {
    %c0_i32 = arith.constant 0 : i32
    %c0_i32_0 = arith.constant 0 : i32
    %c0_i32_1 = arith.constant 0 : i32
    return %c0_i32, %c0_i32_0, %arg0 : i32, i32, i32
  }
}

</mosaic_0001>

<bundles_post_ra>
// kernel: tpu_custom_call.1
= control target key start
LH: loop header
LB: loop body
LE: loop exit
PB: predicated region body
PF: predicated region fallthrough
CT: control target
= control target key end

     0   :  { %13 = vsyncpa [#allocation5], 0  ;;  %s580_s0 = inlined_call_operand.vmem [shape: f32[2,16,32], index: 0, kind: input, shape index: {}]   ;;  %s581_s1 = inlined_call_operand.vmem [shape: f32[1,32], index: 1, kind: input, shape index: {}]   ;;  %s582_s2 = inlined_call_operand.vmem [shape: f32[34,32], index: 2, kind: input, shape index: {}]   ;;  %s583_s3 = inlined_call_operand.vmem [shape: s32[2,16], index: 3, kind: input, shape index: {}]   ;;  %s584_s4 = inlined_call_operand.vmem [shape: s32[2,16], index: 4, kind: input, shape index: {}]   ;;  %s585_s5 = inlined_call_operand.<no memory space> [shape: f32[1], index: 5, kind: input, shape index: {}]   ;;  %s586_s6 = inlined_call_operand.vmem [shape: s32[2,8], index: 6, kind: input, shape index: {}]   ;;  %s587_s7 = inlined_call_operand.hbm [shape: f32[2,8,16], index: 7, kind: output, shape index: {}]  }
   0x1   :  { %14 = vsyncpa [#allocation4], 0  ;;  %s33_s26 = sshll.u32 %s586_s6, 4  ;;  %s34_s26 = int_to_ptr.vmem [resolvable:$true] %s33_s26 }
   0x2   :  { %s362_s27 = scalar_lea.vmem %s34_s26, 32  ;;  %p367_p1 = scmp.lt.s32.totalorder %s34_s26, %s34_s26 }
   0x3   :  { %p363_p0 = scmp.ne.s32.totalorder %s34_s26, %s362_s27  ;;  %p368_p2 = scmp.lt.s32.totalorder %s362_s27, %s362_s27 }
   0x5   :  { %p369_p3 = por %p368_p2, %p367_p1 }
   0x7   :  { %p370_p4 = pnand %p369_p3, %p363_p0 }
   0x9   :  { %373 = shalt.err (!%p370_p4)
}
   0xa   :  { %s430_s28 = smov [#allocation3]  }
   0xb   :  { %36 = dma.vmem_to_smem %s34_s26, 32, %s430_s28, [#allocation5]  }
   0xc   :  { %410 = dma.done.wait [#allocation5], 32  }
   0xd   :  { %411 = vsyncadd [#allocation5], 4294967264 }
   0xe   :  { %40 = sfence }
   0xf   :  { %v320_v0 = vld [vmem:[%s581_s1] ss:$0 sm:$0xff]  ;;  %vm57_vm0 = vcmask 261120   ;;  %v72_v1 = vld [vmem:[%s582_s2 + $0x10] sm:$0xff]  ;;  %v97_v3 = vlaneseq  ;;  %v73_v6 = vld [vmem:[%s582_s2 + $0x18] sm:$0xff]  ;;  %vm92_vm1 = vcmask 254976  }
  0x10   :  { %v70_v2 = vld [vmem:[%s582_s2] sm:$0xff]  ;;  %v77_v4 = vmul.f32 %v320_v0, %v72_v1  ;;  %v71_v7 = vld [vmem:[%s582_s2 + $0x8] sm:$0xff]  ;;  %v78_v8 = vmul.f32 %v320_v0, %v73_v6  ;;  %v45_v27 = vld [vmem:[%s580_s0 + $0x10] sm:$0xff]  ;;  %vm139_vm2 = vcmask 130112   ;;  %vm146_vm3 = vcmask 195712  }
  0x11   :  { %v75_v5 = vmul.f32 %v320_v0, %v70_v2  ;;  %v76_v9 = vmul.f32 %v320_v0, %v71_v7  ;;  %v74_v10 = vld [vmem:[%s582_s2 + $0x20] sm:$0x3]  ;;  %v497_v11 = vand.u32 127, %v97_v3  ;;  %v501_v14 = vshrl.u32 %v97_v3, 7  ;;  %v46_v37 = vld [vmem:[%s580_s0 + $0x18] sm:$0xff]  ;;  %v44_v42 = vld [vmem:[%s580_s0 + $0x8] sm:$0xff] }
  0x12   :  { %v86_v12 = vsel %vm57_vm0, %v77_v4, 0.0  ;;  %v89_v16 = vsel %vm57_vm0, %v78_v8, 0.0  ;;  %v79_v18 = vmul.f32 %v320_v0, %v74_v10  ;;  %v96_v28 = vld [vmem:[%s583_s3] sm:$0x3]  ;;  %v55_v30 = vmul.f32 %v320_v0, %v45_v27 }
  0x13   :  { %v80_v13 = vsel %vm57_vm0, %v75_v5, 0.0  ;;  %87 = vadd.xlane.f32.xlu1 %v86_v12  ;;  %v141_v15 = vadd.s32 4294967280, %v497_v11  ;;  %v83_v17 = vsel %vm57_vm0, %v76_v9, 0.0  ;;  %v509_v21 = vsub.s32 %v497_v11, %v501_v14  ;;  %v43_v31 = vld [vmem:[%s580_s0] sm:$0xff] }
  0x14   :  { %81 = vadd.xlane.f32.xlu0 %v80_v13  ;;  %v93_v20 = vsel %vm92_vm1, %v79_v18, 0.0  ;;  %v148_v22 = vadd.s32 4294967272, %v497_v11  ;;  %v134_v23 = vadd.s32 4294967288, %v497_v11  ;;  %v101_v26 = vsub.s32 0, %v501_v14 }
  0x15   :  { %v144_v19 = vsub.s32 %v141_v15, %v501_v14  ;;  %v155_v29 = vadd.s32 4294967264, %v497_v11  ;;  %v64_v33 = vsel %vm57_vm0, %v55_v30, 0.0  ;;  %v53_v34 = vmul.f32 %v320_v0, %v43_v31 }
  0x16   :  { %v151_v24 = vsub.s32 %v148_v22, %v501_v14  ;;  %v515_v25 = vsub.s32 %v134_v23, %v501_v14  ;;  %v102_v35 = vrot.slane %v96_v28, %v101_v26  ;;  %v112_v36 = vsub.s32 1, %v501_v14 }
  0x17   :  { %90 = vadd.xlane.f32.xlu1 %v89_v16  ;;  %v158_v32 = vsub.s32 %v155_v29, %v501_v14  ;;  %v58_v38 = vsel %vm57_vm0, %v53_v34, 0.0  ;;  %v56_v39 = vmul.f32 %v320_v0, %v46_v37  ;;  %v54_v43 = vmul.f32 %v320_v0, %v44_v42  ;;  %v202_v29 = vld [vmem:[%s584_s4] sm:$0x3] }
  0x18   :  { %84 = vadd.xlane.f32.xlu0 %v83_v17  ;;  %v113_v41 = vrot.slane %v96_v28, %v112_v36  ;;  %vm153_vm4 = vcmask 261312   ;;  %vm160_vm5 = vcmask 326912   ;;  %vm180_vm6 = vcmask 277504  }
  0x19   :  { %v67_v40 = vsel %vm57_vm0, %v56_v39, 0.0  ;;  %v61_v44 = vsel %vm57_vm0, %v54_v43, 0.0  ;;  %v197_v17 = vstv %s585_s5  ;;  %vm162_vm11 = vcmask 1041409   ;;  %s418_s5 = smov 0  }
  0x1a   :  { %vm203_vm12 = vcmp.gt.s32.totalorder %v202_v29, 0  ;;  %v414_v39 = vmov 0  }
  0x1c   :  { %94 = vadd.xlane.f32.xlu0 %v93_v20 }
  0x28   :  { %104 = vbcast.lane.b32.xlu1 %v102_v35, 256 }
  0x2c   :  { %115 = vbcast.lane.b32.xlu1 %v113_v41, 256 }
  0x30   :  { %119 = vbcast.lane.b32.xlu1 %v113_v41, 264 }
  0x32   :  { %108 = vbcast.lane.b32.xlu0 %v102_v35, 264 }
  0x51   :  { %62 = vadd.xlane.f32.xlu0 %v61_v44 }
  0x54   :  { %59 = vadd.xlane.f32.xlu1 %v58_v38 }
  0x55   :  { %65 = vadd.xlane.f32.xlu0 %v64_v33 }
  0x59   :  { %68 = vadd.xlane.f32.xlu0 %v67_v40 }
  0x9c   :  { %v88_v45 = vpop.xlane.xlu1 %87 }
  0x9d   :  { %v82_v46 = vpop.xlane.xlu0 %81  ;;  %v145_v51 = vrot.slane %v88_v45, %v144_v19 }
  0x9e   :  { %v133_v49 = vrot.slane %v82_v46, %v509_v21 }
  0xa0   :  { %v91_v47 = vpop.xlane.xlu1 %90 }
  0xa1   :  { %v85_v48 = vpop.xlane.xlu0 %84  ;;  %v152_v52 = vrot.slane %v91_v47, %v151_v24 }
  0xa2   :  { %v138_v50 = vrot.slane %v85_v48, %v515_v25 }
  0xa4   :  { %v140_v53 = vsel %vm139_vm2, %v138_v50, %v133_v49  ;;  %v105_v55 = vpop.permute.xlu1 %104 }
  0xa5   :  { %v147_v54 = vsel %vm146_vm3, %v145_v51, %v140_v53  ;;  %v95_v56 = vpop.xlane.xlu0 %94  ;;  %vm121_vm7 = vcmp.eq.s32.totalorder %v105_v55, %v497_v11 }
  0xa6   :  { %v154_v57 = vsel %vm153_vm4, %v152_v52, %v147_v54  ;;  %v159_v58 = vrot.slane %v95_v56, %v158_v32 }
  0xa8   :  { %v161_v59 = vsel %vm160_vm5, %v159_v58, %v154_v57  ;;  %v116_v60 = vpop.permute.xlu1 %115 }
  0xa9   :  { %v109_v61 = vpop.permute.xlu0 %108  ;;  %v176_v62 = vsel %vm121_vm7, %v161_v59, 0.0  ;;  %vm123_vm8 = vcmp.eq.s32.totalorder %v116_v60, %v497_v11 }
  0xaa   :  { %vm122_vm9 = vcmp.eq.s32.totalorder %v109_v61, %v497_v11  ;;  %v181_v63 = vsel %vm180_vm6, %v176_v62, 0.0  ;;  %v178_v1 = vsel %vm123_vm8, %v161_v59, 0.0 }
  0xab   :  { %182 = vadd.xlane.f32.xlu1 %v181_v63  ;;  %v177_v0 = vsel %vm122_vm9, %v161_v59, 0.0  ;;  %v187_v4 = vsel %vm180_vm6, %v178_v1, 0.0 }
  0xac   :  { %v184_v2 = vsel %vm180_vm6, %v177_v0, 0.0  ;;  %v120_v3 = vpop.permute.xlu1 %119 }
  0xad   :  { %185 = vadd.xlane.f32.xlu0 %v184_v2  ;;  %vm124_vm10 = vcmp.eq.s32.totalorder %v120_v3, %v497_v11 }
  0xae   :  { %v179_v5 = vsel %vm124_vm10, %v161_v59, 0.0 }
  0xaf   :  { %188 = vadd.xlane.f32.xlu1 %v187_v4  ;;  %v190_v6 = vsel %vm180_vm6, %v179_v5, 0.0 }
  0xb1   :  { %191 = vadd.xlane.f32.xlu0 %v190_v6 }
  0xda   :  { %v63_v7 = vpop.xlane.xlu0 %62 }
  0xdd   :  { %v60_v9 = vpop.xlane.xlu1 %59 }
  0xde   :  { %v66_v8 = vpop.xlane.xlu0 %65 }
  0xe2   :  { %v69_v10 = vpop.xlane.xlu0 %68 }
 0x134   :  { %v183_v12 = vpop.xlane.xlu1 %182 }
 0x135   :  { %v193_v15 = vadd.f32 %v183_v12, %v60_v9 }
 0x136   :  { %v186_v13 = vpop.xlane.xlu0 %185 }
 0x137   :  { %v194_v16 = vadd.f32 %v186_v13, %v63_v7  ;;  %v198_v23 = vadd.f32 %v197_v17, %v193_v15 }
 0x138   :  { %v189_v18 = vpop.xlane.xlu1 %188 }
 0x139   :  { %v199_v19 = vadd.f32 %v197_v17, %v194_v16  ;;  %v195_v20 = vadd.f32 %v189_v18, %v66_v8  ;;  %v211_v31 = vrot.slane %v198_v23, %v509_v21 }
 0x13a   :  { %v192_v22 = vpop.xlane.xlu0 %191 }
 0x13b   :  { %v200_v24 = vadd.f32 %v197_v17, %v195_v20  ;;  %v196_v27 = vadd.f32 %v192_v22, %v69_v10  ;;  %v215_v28 = vrot.slane %v199_v19, %v515_v25 }
 0x13d   :  { %v201_v30 = vadd.f32 %v197_v17, %v196_v27  ;;  %v220_v32 = vrot.slane %v200_v24, %v509_v21  ;;  %v216_v34 = vsel %vm139_vm2, %v215_v28, %v211_v31 }
 0x13f   :  { %v224_v33 = vrot.slane %v201_v30, %v515_v25 }
 0x141   :  { %v225_v35 = vsel %vm139_vm2, %v224_v33, %v220_v32 }
 0x142   :  { %v226_v37 = vsel %vm162_vm11, %v225_v35, %v216_v34 }
 0x143   :  { %v228_v38 = vsel %vm203_vm12, -inf, %v226_v37 }
 0x144 LB: > { %s241_s4 = sld [smem:[#allocation3 + %s420_s5]]  ;;  %v244_v40 = vstv %s420_s5  ;;  %v431_v25 = vmov 0   ;;  %s239_s5 = sadd.s32 1, %s420_s5   ;;  %s420_s5 = sphi %s418_s5, %s239_s5   ;;  %v416_v39 = vphi %v414_v39, %v415_v39  }
 0x145   : > { %vm245_vm13 = vcmp.ge.s32.totalorder %v501_v14, %v244_v40  ;;  %p236_p5 = scmp.ge.s32.totalorder %s239_s5, 8  }
 0x146   :  { %v252_v43 = vrot.slane (%p236_p5), %v228_v38, %v101_v26  ;;  %vm255_vm1 = vcmask (%p236_p5), 130048   ;;  %v422_v45 = vmov (%p236_p5), 0   ;;  %s426_s27 = smov (%p236_p5), 0  }
 0x14a   : > { %v242_v21 = vstv %s241_s4 }
 0x14b   : > { %vm243_vm14 = vcmp.eq.s32.totalorder %v497_v11, %v242_v21 }
 0x14c   : > { %vm246_vm15 = vmand %vm243_vm14, %vm245_vm13  ;;  %238 = sbr.rel (!%p236_p5) target bundleno = 324 (0x144), region = 67 }
 0x14d   : > { %v247_v41 = vsel %vm246_vm15, 1, %v431_v25 }
 0x14e   : > { %v248_v42 = vor.u32 %v416_v39, %v247_v41  }
 0x150   : > { %v415_v39 = vmov %v248_v42   ;;  %vm253_vm0 = vcmp.gt.s32.totalorder (%p236_p5), %v248_v42, 0 }
 0x151   :  { %v254_v44 = vsel %vm253_vm0, -inf, %v252_v43 }
 0x152   :  { %256 = vst.msk [vmem:[#allocation6] sm:$0xff] %vm255_vm1, %v254_v44 }
 0x153 LB: > { %s264_s28 = sshra.s32 %s428_s27, 7  ;;  %s269_s29 = sand.u32 127, %s428_s27  ;;  %v274_v46 = vstv %s428_s27  ;;  %v432_v47 = vmov 0   ;;  %s428_s27 = sphi %s426_s27, %s262_s27   ;;  %v424_v45 = vphi %v422_v45, %v423_v45  }
 0x154   : > { %s322_s30 = sshll.u32 %s264_s28, 7  ;;  %vm275_vm2 = vcmp.ge.s32.totalorder %v501_v14, %v274_v46  ;;  %s262_s27 = sadd.s32 1, %s428_s27  }
 0x155   : > { %s323_s8 = sadd.s32 128, %s322_s30  ;;  %p259_p6 = scmp.ge.s32.totalorder %s262_s27, 8  }
 0x156   : > { %s270_s6 = sadd.s32 %s323_s8, %s269_s29  ;;  %v282_v50 = vrot.slane (%p259_p6), %v228_v38, %v112_v36  ;;  %s433_s10 = smov (%p259_p6), [#allocation6]  }
 0x157   : > { %s271_s9 = sld [smem:[#allocation3 + %s270_s6]]  ;;  %s292_s11 = sshll.u32 (%p259_p6), %s433_s10, 4  ;;  %s293_s11 = int_to_ptr.vmem [resolvable:$true] %s292_s11 }
 0x158   :  { %s374_s12 = scalar_lea.vmem (%p259_p6), %s293_s11, 256  ;;  %p379_p8 = scmp.lt.s32.totalorder (%p259_p6), %s293_s11, %s293_s11 }
 0x159   :  { %p375_p7 = scmp.ne.s32.totalorder (%p259_p6), %s293_s11, %s374_s12  ;;  %p380_p9 = scmp.lt.s32.totalorder (%p259_p6), %s374_s12, %s374_s12 }
 0x15b   :  { %p381_p10 = por (%p259_p6), %p380_p9, %p379_p8 }
 0x15d   : > { %v272_v26 = vstv %s271_s9  ;;  %p382_p11 = pnand (%p259_p6), %p381_p10, %p375_p7 }
 0x15e   : > { %vm273_vm3 = vcmp.eq.s32.totalorder %v497_v11, %v272_v26 }
 0x15f   : > { %vm276_vm4 = vmand %vm273_vm3, %vm275_vm2  ;;  %261 = sbr.rel (!%p259_p6) target bundleno = 339 (0x153), region = 78 }
 0x160   : > { %v277_v48 = vsel %vm276_vm4, 1, %v432_v47 }
 0x161   : > { %v278_v49 = vor.u32 %v424_v45, %v277_v48  }
 0x163   : > { %v423_v45 = vmov %v278_v49   ;;  %vm283_vm5 = vcmp.gt.s32.totalorder (%p259_p6), %v278_v49, 0 }
 0x164   :  { %v284_v51 = vsel %vm283_vm5, -inf, %v282_v50 }
 0x165   :  { %286 = vst.msk [vmem:[#allocation6 + $0x8] sm:$0xff] %vm255_vm1, %v284_v51 }
 0x166   :  { %385 = shalt.err (!%p382_p11)
}
 0x167   :  { %s434_s13 = smov 128   ;;  %s435_s14 = smov 8  }
 0x168   :  { %298 = dma.vmem_to_hbm [thread:$0]  %s293_s11, 256, %s587_s7, [#allocation4], %s434_s13, %s434_s13, %s435_s14  }
 0x169   :  { %412 = dma.done.wait [#allocation4], 256  }
 0x16a   :  { %413 = vsyncadd [#allocation4], 4294967040 }
 0x16b   :  { %302 = vsyncpa [#allocation4], 1 }
 0x16c   :  { %303 = vsyncpa [#allocation5], 1 }

</bundles_post_ra>
